<compile_context>
chip_gen: v7x
topology: tpu7x:2x2x1
jax: 0.10.0
libtpu: 0.0.40
codegen_flags: <defaults>
</compile_context>

<pallas_src>
import functools

import numpy as np
import jax
import jax.numpy as jnp
from jax import lax
from jax.experimental import pallas as pl
from jax.experimental.pallas import tpu as pltpu


# -----------------------------------------------------------------------------
# pltpu.roll rotation-convention probe (run once, cached).
# -----------------------------------------------------------------------------
_ROLL_SIGN = None


def _get_roll_sign():
    """+1 if pltpu.roll matches np.roll (out[i] = in[(i - shift) % n]), else -1."""
    global _ROLL_SIGN
    if _ROLL_SIGN is not None:
        return _ROLL_SIGN

    def _probe_kernel(x_ref, o_ref):
        o_ref[...] = pltpu.roll(x_ref[...], 1, 0)

    x = jnp.tile(jnp.arange(8, dtype=jnp.float32)[:, None], (1, 128))
    y = np.asarray(
        pl.pallas_call(
            _probe_kernel,
            out_shape=jax.ShapeDtypeStruct((8, 128), jnp.float32))(x))
    base = np.arange(8, dtype=np.float32)
    if np.array_equal(y[:, 0], np.roll(base, 1)):
        _ROLL_SIGN = 1
    elif np.array_equal(y[:, 0], np.roll(base, -1)):
        _ROLL_SIGN = -1
    else:
        raise RuntimeError("could not determine pltpu.roll convention")
    return _ROLL_SIGN


def _roll(x, shift, axis):
    """pltpu.roll with np.roll semantics: out[i] = in[(i - shift) % n]."""
    n = x.shape[axis]
    s = shift % n
    if s == 0:
        return x
    if _get_roll_sign() < 0:
        s = (n - s) % n
    return pltpu.roll(x, s, axis)


# -----------------------------------------------------------------------------
# In-kernel building blocks (everything lane-dense, all matmuls bf16 -> f32).
# -----------------------------------------------------------------------------
def _edge_masks(R, S):
    """(R,1) f32 {0,1} masks killing per-image top / bottom halo rows."""
    r = lax.broadcasted_iota(jnp.int32, (R, 1), 0) % S
    return ((r != 0).astype(jnp.float32),
            (r != S - 1).astype(jnp.float32))


def _conv3x3_relu(x, t_ref, bt_ref, mask_up, mask_dn):
    """3x3 / stride 1 / pad 1 conv + bias + ReLU on stacked "rows" activations.

    x       : (R, S*Cin) f32, R = Bt*S rows (Bt images stacked), lanes = (w, cin)
    t_ref   : (3, S*Cin, S*Cout) bf16 banded matrices, one per kernel row dy
              (the W zero padding is encoded by clipping the band)
    bt_ref  : (1, S*Cout) f32 bias tiled across w
    mask_*  : (R, 1) f32 masks zeroing rows that wrapped across an image
              boundary after the +-1 sublane roll (they implement H padding)
    """
    xc = x.astype(jnp.bfloat16)
    xu = (_roll(x, 1, 0) * mask_up).astype(jnp.bfloat16)    # row h-1 (or zeros)
    xd = (_roll(x, -1, 0) * mask_dn).astype(jnp.bfloat16)   # row h+1 (or zeros)
    y = jnp.dot(xc, t_ref[1], preferred_element_type=jnp.float32)
    y = y + jnp.dot(xu, t_ref[0], preferred_element_type=jnp.float32)
    y = y + jnp.dot(xd, t_ref[2], preferred_element_type=jnp.float32)
    return jnp.maximum(y + bt_ref[...], 0.0)


def _maxpool2x2(a, rse_ref, cse_ref, C):
    """2x2 / stride 2 max pool on the rows layout.

    Pair maxes ride the XLU (roll) + VPU (max); each axis then needs a single
    exact bf16 0/1 compaction matmul.  a: (R, S*C) f32 -> (R//2, (S//2)*C) f32.
    """
    hm = jnp.maximum(a, _roll(a, -1, 0)).astype(jnp.bfloat16)      # valid at even rows
    hr = jnp.dot(rse_ref[...], hm, preferred_element_type=jnp.float32)
    wm = jnp.maximum(hr, _roll(hr, -C, 1)).astype(jnp.bfloat16)    # valid at even w blocks
    return jnp.dot(wm, cse_ref[...], preferred_element_type=jnp.float32)


def _make_kernel(S1, HID, Bt, N_PAD):
    S2, S3 = S1 // 2, S1 // 4

    def kernel(x_ref,
               t1, bt1, t2, bt2, t3, bt3, t4, bt4,
               rse1, cse1, rse2, cse2,
               wlw, selb, blp,
               o_ref):
        m1u, m1d = _edge_masks(Bt * S1, S1)
        m2u, m2d = _edge_masks(Bt * S2, S2)
        # conv_block1
        a = _conv3x3_relu(x_ref[...], t1, bt1, m1u, m1d)        # (Bt*S1, S1*HID)
        a = _conv3x3_relu(a, t2, bt2, m1u, m1d)
        a = _maxpool2x2(a, rse1, cse1, HID)                     # (Bt*S2, S2*HID)
        # conv_block2
        a = _conv3x3_relu(a, t3, bt3, m2u, m2d)
        a = _conv3x3_relu(a, t4, bt4, m2u, m2d)
        a = _maxpool2x2(a, rse2, cse2, HID)                     # (Bt*S3, S3*HID)
        # classifier: Flatten(NCHW) + Linear, lane dense.
        #   y[r, h*N + o] = a[r, :] @ wl[h]           (one bf16 matmul, all h)
        #   z[r, o]       = y[r, (r % S3)*N + o]      (iota-mask select, VPU)
        #   logits[b, o]  = sum_{r in image b} z[r,o] (tiny 0/1 row-sum matmul)
        ab = a.astype(jnp.bfloat16)                             # (Bt*S3, S3*HID)
        y = jnp.dot(ab, wlw[...], preferred_element_type=jnp.float32)
        hrow = lax.broadcasted_iota(jnp.int32, (Bt * S3, 1), 0) % S3
        z = jnp.zeros((Bt * S3, N_PAD), jnp.float32)
        for h in range(S3):                                     # static unroll
            z = z + jnp.where(hrow == h, y[:, h * N_PAD:(h + 1) * N_PAD], 0.0)
        o_ref[...] = jnp.dot(selb[...], z,
                             preferred_element_type=jnp.float32) + blp[...]

    return kernel


# -----------------------------------------------------------------------------
# Constant builders (run ONCE, outside the per-forward path).
# -----------------------------------------------------------------------------
def _conv_band_matrices(w_oihw, S):
    """PyTorch (Cout, Cin, 3, 3) -> (3, S*Cin, S*Cout) bf16 banded matrices.

    T_dy[w_in*Cin + ci, w_out*Cout + co] = w[co, ci, dy, w_in - w_out + 1]
    (zeros outside the band == zero padding along W)."""
    c_out, c_in = w_oihw.shape[0], w_oihw.shape[1]
    w_hwio = jnp.transpose(w_oihw, (2, 3, 1, 0))          # (dy, dx, ci, co)
    r = jnp.arange(S * c_in)
    q = jnp.arange(S * c_out)
    w_in, ci = r // c_in, r % c_in
    w_out, co = q // c_out, q % c_out
    dx = w_in[:, None] - w_out[None, :] + 1               # (S*Cin, S*Cout)
    valid = (dx >= 0) & (dx <= 2)
    dxc = jnp.clip(dx, 0, 2)

    def band(dy):
        vals = w_hwio[dy][dxc, ci[:, None], co[None, :]]
        return jnp.where(valid, vals, 0.0)

    return jnp.stack([band(0), band(1), band(2)]).astype(jnp.bfloat16)


def _tiled_bias(b, S):
    return jnp.tile(b, (S,)).reshape(1, S * b.shape[0]).astype(jnp.float32)


def _even_row_selector(R):
    """(R//2, R) bf16 0/1 selector picking rows 0, 2, 4, ... (exact in bf16)."""
    k = jnp.arange(R // 2)
    r = jnp.arange(R)
    return (r[None, :] == 2 * k[:, None]).astype(jnp.bfloat16)


def _even_col_selector(S, C):
    """(S*C, (S//2)*C) bf16 0/1 selector picking even-w lane blocks."""
    lane_in = jnp.arange(S * C)
    lane_out = jnp.arange((S // 2) * C)
    wo, c = lane_out // C, lane_out % C
    return (lane_in[:, None] == (2 * wo * C + c)[None, :]).astype(jnp.bfloat16)


def _classifier_wide(wl, bl, s3, hid, n_pad):
    """Fold nn.Flatten(NCHW) + nn.Linear into the kernel's (h, w*C+c) layout.

    Returns wlw (s3*hid, s3*n_pad) bf16 with wlw[w*hid+c, h*n_pad+o] =
    wl[o, c*s3*s3 + h*s3 + w], and blp (1, n_pad) f32 zero padded bias."""
    n_out = wl.shape[0]
    w4 = wl.reshape(n_out, hid, s3, s3)                   # (o, c, h, w)
    w4 = jnp.transpose(w4, (2, 3, 1, 0))                  # (h, w, c, o)
    w4 = w4.reshape(s3, s3 * hid, n_out)                  # (h, w*C+c, o)
    w4 = jnp.pad(w4, ((0, 0), (0, 0), (0, n_pad - n_out)))
    wlw = jnp.transpose(w4, (1, 0, 2)).reshape(s3 * hid, s3 * n_pad)
    blp = jnp.pad(bl, (0, n_pad - n_out)).reshape(1, n_pad)
    return wlw.astype(jnp.bfloat16), blp.astype(jnp.float32)


def _batch_selector(Bt, s3):
    """(Bt, Bt*s3) f32 0/1 selector summing the per-row classifier partials."""
    b = jnp.arange(Bt)
    r = jnp.arange(Bt * s3)
    return (r[None, :] // s3 == b[:, None]).astype(jnp.float32)


def prepare_tinyvgg_constants(p, H, Bt, n_pad=128):
    """Expand raw PyTorch-layout params into the kernel constant set, once.

    The banded expansion is much larger than the raw weights, so it is cached
    here instead of being rebuilt (and re-streamed through HBM) every forward.
    """
    hid = p['b1'].shape[0]
    n_out = p['bl'].shape[0]
    assert n_out <= n_pad
    s1, s2, s3 = H, H // 2, H // 4
    consts = dict(
        t1=_conv_band_matrices(p['w1'], s1), bt1=_tiled_bias(p['b1'], s1),
        t2=_conv_band_matrices(p['w2'], s1), bt2=_tiled_bias(p['b2'], s1),
        t3=_conv_band_matrices(p['w3'], s2), bt3=_tiled_bias(p['b3'], s2),
        t4=_conv_band_matrices(p['w4'], s2), bt4=_tiled_bias(p['b4'], s2),
        rse1=_even_row_selector(Bt * s1), cse1=_even_col_selector(s1, hid),
        rse2=_even_row_selector(Bt * s2), cse2=_even_col_selector(s2, hid),
        selb=_batch_selector(Bt, s3),
    )
    consts['wlw'], consts['blp'] = _classifier_wide(p['wl'], p['bl'],
                                                    s3, hid, n_pad)
    _get_roll_sign()   # run the roll-convention probe before any kernel trace
    return consts


# -----------------------------------------------------------------------------
# Fused forward pass.
# -----------------------------------------------------------------------------
def tinyvgg_forward(x_nchw, c, *, n_out):
    """Fused TinyVGG forward.  x_nchw: (B, Cin, H, W) f32, returns (B, n_out)."""
    B, c_in, H, W = x_nchw.shape
    assert H == W and H % 4 == 0
    hid = c['bt1'].shape[1] // H
    Bt = c['selb'].shape[0]
    n_pad = c['blp'].shape[1]
    assert B % Bt == 0
    s1 = H

    # NCHW -> lane-dense stacked rows: (B//Bt, Bt*H, W*Cin), channels fastest
    # on lanes; Bt consecutive images are stacked along the sublane axis so
    # every conv / pool matmul sees Bt*S rows.
    x_rows = jnp.transpose(x_nchw, (0, 2, 3, 1)).astype(jnp.float32)
    x_rows = x_rows.reshape(B // Bt, Bt * s1, s1 * c_in)

    kernel = _make_kernel(s1, hid, Bt, n_pad)

    def _const_spec(a):
        zeros = (0,) * a.ndim
        return pl.BlockSpec(a.shape, lambda i: zeros)

    order = ['t1', 'bt1', 't2', 'bt2', 't3', 'bt3', 't4', 'bt4',
             'rse1', 'cse1', 'rse2', 'cse2', 'wlw', 'selb', 'blp']
    const_args = [c[k] for k in order]

    # Constant operands have constant index maps -> DMA'd once per call; the
    # whole (bf16) constant set is ~3.9 MiB (~7.7 MiB double-buffered), well
    # inside the 32 MiB scoped VMEM on v5e / v6e / v7x.
    out = pl.pallas_call(
        kernel,
        out_shape=jax.ShapeDtypeStruct((B // Bt, Bt, n_pad), jnp.float32),
        grid=(B // Bt,),
        in_specs=[pl.BlockSpec((None, Bt * s1, s1 * c_in), lambda i: (i, 0, 0))]
                 + [_const_spec(a) for a in const_args],
        out_specs=pl.BlockSpec((None, Bt, n_pad), lambda i: (i, 0, 0)),
        compiler_params=pltpu.CompilerParams(
            dimension_semantics=("parallel",),
            vmem_limit_bytes=32 * 1024 * 1024),
    )(x_rows, *const_args)
    return out.reshape(B, n_pad)[:, :n_out]


# -----------------------------------------------------------------------------
# Pure-JAX reference (correctness check only).
# -----------------------------------------------------------------------------
def ref_forward(x, p):
    def conv(x, w, b):
        y = lax.conv_general_dilated(
            x, w, window_strides=(1, 1), padding='SAME',
            dimension_numbers=('NCHW', 'OIHW', 'NCHW'))
        return jax.nn.relu(y + b[None, :, None, None])

    def pool(x):
        return lax.reduce_window(x, -jnp.inf, lax.max,
                                 (1, 1, 2, 2), (1, 1, 2, 2), 'VALID')

    x = pool(conv(conv(x, p['w1'], p['b1']), p['w2'], p['b2']))
    x = pool(conv(conv(x, p['w3'], p['b3']), p['w4'], p['b4']))
    x = x.reshape(x.shape[0], -1)
    return x @ p['wl'].T + p['bl']


# -----------------------------------------------------------------------------
if __name__ == "__main__":
    # The module's classifier hardcodes Linear(hidden*16*16, output), which
    # (with two 2x2 max pools) implies a 64x64 spatial input.
    B, CIN, HIDDEN, OUT, HW, BT = 8, 3, 8, 5, 64, 4

    key = jax.random.PRNGKey(0)
    ks = jax.random.split(key, 11)

    def init(k, shape, scale):
        return scale * jax.random.normal(k, shape, jnp.float32)

    params = {
        'w1': init(ks[0], (HIDDEN, CIN, 3, 3), 0.1),
        'b1': init(ks[1], (HIDDEN,), 0.1),
        'w2': init(ks[2], (HIDDEN, HIDDEN, 3, 3), 0.1),
        'b2': init(ks[3], (HIDDEN,), 0.1),
        'w3': init(ks[4], (HIDDEN, HIDDEN, 3, 3), 0.1),
        'b3': init(ks[5], (HIDDEN,), 0.1),
        'w4': init(ks[6], (HIDDEN, HIDDEN, 3, 3), 0.1),
        'b4': init(ks[7], (HIDDEN,), 0.1),
        'wl': init(ks[8], (OUT, HIDDEN * 16 * 16), 0.02),
        'bl': init(ks[9], (OUT,), 0.02),
    }
    x = jax.random.normal(ks[10], (B, CIN, HW, HW), jnp.float32)

    consts = prepare_tinyvgg_constants(params, HW, BT)   # built & cached once
    fwd = jax.jit(functools.partial(tinyvgg_forward, n_out=OUT))

    out = jax.block_until_ready(fwd(x, consts))
    ref = jax.block_until_ready(ref_forward(x, params))

    # bf16 matmul operands (f32 accumulation) vs an all-f32 XLA reference.
    np.testing.assert_allclose(np.asarray(out), np.asarray(ref),
                               rtol=3e-2, atol=3e-2)
    print("KERNEL_OK")
</pallas_src>

<mosaic_0001>
module attributes {stable_mosaic.version = 11 : i64} {
  func.func @_probe_kernel(%arg0: memref<8x128xf32, #tpu.memory_space<vmem>>, %arg1: memref<8x128xf32, #tpu.memory_space<vmem>>) attributes {dimension_semantics = [], scalar_prefetch = 0 : i64, scratch_operands = 0 : i64, tpu.core_type = #tpu.core_type<tc>} {
    %c0 = arith.constant 0 : index
    %c0_0 = arith.constant 0 : index
    %0 = vector.load %arg0[%c0, %c0_0] : memref<8x128xf32, #tpu.memory_space<vmem>>, vector<8x128xf32>
    %c1_i32 = arith.constant 1 : i32
    %1 = tpu.dynamic_rotate %0 by %c1_i32 dim 0 : vector<8x128xf32>, i32 -> vector<8x128xf32>
    %c0_1 = arith.constant 0 : index
    %c0_2 = arith.constant 0 : index
    %2 = vector.load %arg1[%c0_1, %c0_2] : memref<8x128xf32, #tpu.memory_space<vmem>>, vector<8x128xf32>
    tpu.vector_store %arg1[%c0_1, %c0_2], %1 {strides = array<i32>} : memref<8x128xf32, #tpu.memory_space<vmem>>, vector<8x128xf32>,
    return
  }
}

</mosaic_0001>

<bundles_post_ra>
// kernel: tpu_custom_call.1
= control target key start
LH: loop header
LB: loop body
LE: loop exit
PB: predicated region body
PF: predicated region fallthrough
CT: control target
= control target key end

     0   :  { %6 = vsyncpa [#allocation3], 0  ;;  %s125_s0 = inlined_call_operand.hbm [shape: f32[8,128], index: 0, kind: input, shape index: {}]   ;;  %s126_s1 = inlined_call_operand.hbm [shape: f32[8,128], index: 1, kind: output, shape index: {}]  }
   0x1   :  { %7 = vsyncpa [#allocation4], 0  ;;  %s89_s6 = smov [#allocation2]   ;;  %s41_s10 = scalar_lea.hbm %s125_s0, 128 }
   0x2   :  { %s14_s7 = sshll.u32 %s89_s6, 4  ;;  %p42_p0 = scmp.ne.s32.totalorder %s125_s0, %s41_s10  ;;  %s15_s7 = int_to_ptr.vmem [resolvable:$true] %s14_s7 }
   0x3   :  { %p45_p1 = scmp.lt.u32.totalorder %s41_s10, %s125_s0 }
   0x5   :  { %p47_p2 = pnand %p45_p1, %p42_p0 }
   0x7   :  { %50 = shalt.err (!%p47_p2)
}
   0x8   :  { %s51_s15 = scalar_lea.vmem %s15_s7, 128  ;;  %p56_p4 = scmp.lt.s32.totalorder %s15_s7, %s15_s7 }
   0x9   :  { %p52_p3 = scmp.ne.s32.totalorder %s15_s7, %s51_s15  ;;  %p57_p5 = scmp.lt.s32.totalorder %s51_s15, %s51_s15 }
   0xb   :  { %p58_p6 = por %p57_p5, %p56_p4 }
   0xd   :  { %p59_p7 = pnand %p58_p6, %p52_p3 }
   0xf   :  { %62 = shalt.err (!%p59_p7)
}
  0x10   :  { %17 = dma.hbm_to_vmem [thread:$0]  %s125_s0, 128, %s15_s7, [#allocation3]  }
  0x11   :  { %85 = dma.done.wait [#allocation3], 128  }
  0x12   :  { %86 = vsyncadd [#allocation3], 4294967168  ;;  %s90_s18 = smov [#allocation5]   ;;  %v21_v0 = vld [vmem:[#allocation2] sm:$0xff] }
  0x13   :  { %s30_s19 = sshll.u32 %s90_s18, 4  ;;  %v22_v1 = vrot.slane %v21_v0, 7  ;;  %s31_s19 = int_to_ptr.vmem [resolvable:$true] %s30_s19 }
  0x14   :  { %s63_s20 = scalar_lea.vmem %s31_s19, 128  ;;  %p68_p9 = scmp.lt.s32.totalorder %s31_s19, %s31_s19 }
  0x15   :  { %23 = vst [vmem:[#allocation5] sm:$0xff] %v22_v1  ;;  %p64_p8 = scmp.ne.s32.totalorder %s31_s19, %s63_s20  ;;  %p69_p10 = scmp.lt.s32.totalorder %s63_s20, %s63_s20 }
  0x17   :  { %p70_p11 = por %p69_p10, %p68_p9 }
  0x19   :  { %p71_p12 = pnand %p70_p11, %p64_p8 }
  0x1b   :  { %74 = shalt.err (!%p71_p12)
}
  0x1c   :  { %s75_s23 = scalar_lea.hbm %s126_s1, 128 }
  0x1d   :  { %p76_p13 = scmp.ne.s32.totalorder %s126_s1, %s75_s23  ;;  %p79_p0 = scmp.lt.u32.totalorder %s75_s23, %s126_s1 }
  0x1f   :  { %p81_p1 = pnand %p79_p0, %p76_p13 }
  0x21   :  { %84 = shalt.err (!%p81_p1)
}
  0x22   :  { %33 = dma.vmem_to_hbm [thread:$0]  %s31_s19, 128, %s126_s1, [#allocation4]  }
  0x23   :  { %87 = dma.done.wait [#allocation4], 128  }
  0x24   :  { %88 = vsyncadd [#allocation4], 4294967168 }
  0x25   :  { %37 = vsyncpa [#allocation3], 1 }
  0x26   :  { %38 = vsyncpa [#allocation4], 1 }

</bundles_post_ra>
